<compile_context>
chip_gen: v7x
topology: tpu7x:2x2x1
jax: 0.10.0
libtpu: 0.0.40
codegen_flags: <defaults>
</compile_context>

<pallas_src>
import functools

import jax
import jax.numpy as jnp
from jax.experimental import pallas as pl
from jax.experimental.pallas import tpu as pltpu

NUM_CHANNELS = 4   # sEMG channels (ds.NUM_CHANNELS)
HIDDEN_UNITS = 8
NUM_CLASSES = 9    # gesture classes (ds.NUM_CLASSES)
BN_EPS = 1e-5

LANE = 128
MAX_TB = 4096      # lanes per grid step (batch tile); small enough for all gens


def _round_up(n, m):
    return ((n + m - 1) // m) * m


def _mlp_kernel(x_ref, w0_ref, b0_ref, w1_ref, o_ref):
    # x_ref:  (C, TB)   batch on lanes
    # w0_ref: (H, C)    BN-folded fc0 weight
    # b0_ref: (H, 1)    BN-folded bias, lane-broadcast
    # w1_ref: (NC, H)   fc1 weight
    # o_ref:  (NC, TB)
    h = jnp.dot(w0_ref[...], x_ref[...], preferred_element_type=jnp.float32)
    h = jnp.maximum(h + b0_ref[...], 0.0)
    o_ref[...] = jnp.dot(w1_ref[...], h,
                         preferred_element_type=jnp.float32).astype(o_ref.dtype)


@functools.partial(jax.jit, static_argnames=())
def mlp_uniboinail_forward(x, w0, w1, gamma, beta, running_mean, running_var):
    """Forward pass of MLPUniboINAIL (eval-mode BN).

    Args:
      x:  (B, NUM_CHANNELS) f32 input (PyTorch layout).
      w0: (HIDDEN_UNITS, NUM_CHANNELS) f32, PyTorch fc0.weight layout.
      w1: (NUM_CLASSES, HIDDEN_UNITS)  f32, PyTorch fc1.weight layout.
      gamma/beta/running_mean/running_var: (HIDDEN_UNITS,) BN parameters.
    Returns:
      (B, NUM_CLASSES) f32 logits.
    """
    B = x.shape[0]

    # ---- Fold BatchNorm1d (eval) into fc0 on the host. ----
    scale = gamma * jax.lax.rsqrt(running_var + BN_EPS)        # (H,)
    w0_eff = w0 * scale[:, None]                               # (H, C)
    b0_eff = (beta - running_mean * scale)[:, None]            # (H, 1)

    # ---- Transpose so batch is on the lane axis, pad to a tile multiple. ----
    tb = min(MAX_TB, _round_up(B, LANE))
    b_pad = _round_up(B, tb)
    x_t = jnp.transpose(x)                                     # (C, B)
    if b_pad != B:
        x_t = jnp.pad(x_t, ((0, 0), (0, b_pad - B)))

    grid = (b_pad // tb,)

    y_t = pl.pallas_call(
        _mlp_kernel,
        out_shape=jax.ShapeDtypeStruct((NUM_CLASSES, b_pad), jnp.float32),
        grid_spec=pltpu.PrefetchScalarGridSpec(
            num_scalar_prefetch=0,
            grid=grid,
            in_specs=[
                pl.BlockSpec((NUM_CHANNELS, tb), lambda i: (0, i)),
                # Grid-invariant operands: fetched once, stay VMEM resident.
                pl.BlockSpec((HIDDEN_UNITS, NUM_CHANNELS), lambda i: (0, 0)),
                pl.BlockSpec((HIDDEN_UNITS, 1), lambda i: (0, 0)),
                pl.BlockSpec((NUM_CLASSES, HIDDEN_UNITS), lambda i: (0, 0)),
            ],
            out_specs=pl.BlockSpec((NUM_CLASSES, tb), lambda i: (0, i)),
        ),
        compiler_params=pltpu.CompilerParams(
            dimension_semantics=("parallel",)),
    )(x_t, w0_eff, b0_eff, w1)

    # Back to PyTorch layout (B, NUM_CLASSES), drop padding.
    return jnp.transpose(y_t[:, :B])


def reference_forward(x, w0, w1, gamma, beta, running_mean, running_var):
    """Pure-JAX reference with the original (unfolded) BN-eval math."""
    h = x @ w0.T
    h = gamma * (h - running_mean) * jax.lax.rsqrt(running_var + BN_EPS) + beta
    h = jnp.maximum(h, 0.0)
    return h @ w1.T


if __name__ == "__main__":
    key = jax.random.PRNGKey(0)
    k_x, k_w0, k_w1, k_g, k_b, k_m, k_v = jax.random.split(key, 7)

    batch = 8
    x = jax.random.normal(k_x, (batch, NUM_CHANNELS), dtype=jnp.float32)

    # Deterministic parameter init in PyTorch layouts.
    w0 = jax.random.normal(k_w0, (HIDDEN_UNITS, NUM_CHANNELS),
                           dtype=jnp.float32) * 0.5
    w1 = jax.random.normal(k_w1, (NUM_CLASSES, HIDDEN_UNITS),
                           dtype=jnp.float32) * 0.5

    gamma = 1.0 + 0.1 * jax.random.normal(k_g, (HIDDEN_UNITS,), jnp.float32)
    beta = 0.1 * jax.random.normal(k_b, (HIDDEN_UNITS,), jnp.float32)
    running_mean = 0.1 * jax.random.normal(k_m, (HIDDEN_UNITS,), jnp.float32)
    running_var = jnp.abs(
        1.0 + 0.1 * jax.random.normal(k_v, (HIDDEN_UNITS,), jnp.float32))

    y = mlp_uniboinail_forward(x, w0, w1, gamma, beta, running_mean,
                               running_var)
    jax.block_until_ready(y)

    y_ref = reference_forward(x, w0, w1, gamma, beta, running_mean,
                              running_var)
    assert y.shape == (batch, NUM_CLASSES)
    assert jnp.allclose(y, y_ref, atol=1e-5, rtol=1e-5), "mismatch vs reference"

    print("KERNEL_OK")
</pallas_src>

<mosaic_0001>
module attributes {stable_mosaic.version = 11 : i64} {
  func.func @_mlp_kernel(%arg0: i32, %arg1: memref<4x128xf32, #tpu.memory_space<vmem>>, %arg2: memref<8x4xf32, #tpu.memory_space<vmem>>, %arg3: memref<8x1xf32, #tpu.memory_space<vmem>>, %arg4: memref<9x8xf32, #tpu.memory_space<vmem>>, %arg5: memref<9x128xf32, #tpu.memory_space<vmem>>) attributes {dimension_semantics = [#tpu.dimension_semantics<parallel>], iteration_bounds = array<i64: 1>, scalar_prefetch = 0 : i64, scratch_operands = 0 : i64, tpu.core_type = #tpu.core_type<tc>, window_params = [{transform_indices = @transform_0, window_bounds = array<i64: 4, 128>}, {pipeline_mode = #tpu.pipeline_mode<synchronous>, transform_indices = @transform_1, window_bounds = array<i64: 8, 4>}, {pipeline_mode = #tpu.pipeline_mode<synchronous>, transform_indices = @transform_2, window_bounds = array<i64: 8, 1>}, {pipeline_mode = #tpu.pipeline_mode<synchronous>, transform_indices = @transform_3, window_bounds = array<i64: 9, 8>}, {transform_indices = @transform_4, window_bounds = array<i64: 9, 128>}]} {
    %c0 = arith.constant 0 : index
    %c0_0 = arith.constant 0 : index
    %0 = vector.load %arg2[%c0, %c0_0] : memref<8x4xf32, #tpu.memory_space<vmem>>, vector<8x4xf32>
    %c0_1 = arith.constant 0 : index
    %c0_2 = arith.constant 0 : index
    %1 = vector.load %arg1[%c0_1, %c0_2] : memref<4x128xf32, #tpu.memory_space<vmem>>, vector<4x128xf32>
    %cst = arith.constant dense<0.000000e+00> : vector<8x128xf32>
    %2 = tpu.matmul %0, %1, %cst {dimension_numbers = #tpu.dot_dimension_numbers<[1], [0], [0], [1], [0, 0, 1, 1], [], []>} : vector<8x4xf32>, vector<4x128xf32>, vector<8x128xf32> -> vector<8x128xf32>
    %c0_3 = arith.constant 0 : index
    %c0_4 = arith.constant 0 : index
    %3 = vector.load %arg3[%c0_3, %c0_4] : memref<8x1xf32, #tpu.memory_space<vmem>>, vector<8x1xf32>
    %4 = vector.broadcast %3 : vector<8x1xf32> to vector<8x128xf32>
    %5 = arith.addf %2, %4 : vector<8x128xf32>
    %cst_5 = arith.constant 0.000000e+00 : f32
    %6 = vector.broadcast %cst_5 : f32 to vector<8x128xf32>
    %7 = arith.maximumf %5, %6 : vector<8x128xf32>
    %c0_6 = arith.constant 0 : index
    %c0_7 = arith.constant 0 : index
    %8 = vector.load %arg4[%c0_6, %c0_7] : memref<9x8xf32, #tpu.memory_space<vmem>>, vector<9x8xf32>
    %cst_8 = arith.constant dense<0.000000e+00> : vector<9x128xf32>
    %9 = tpu.matmul %8, %7, %cst_8 {dimension_numbers = #tpu.dot_dimension_numbers<[1], [0], [0], [1], [0, 0, 1, 1], [], []>} : vector<9x8xf32>, vector<8x128xf32>, vector<9x128xf32> -> vector<9x128xf32>
    %c0_9 = arith.constant 0 : index
    %c0_10 = arith.constant 0 : index
    %10 = vector.load %arg5[%c0_9, %c0_10] : memref<9x128xf32, #tpu.memory_space<vmem>>, vector<9x128xf32>
    tpu.vector_store %arg5[%c0_9, %c0_10], %9 {strides = array<i32>} : memref<9x128xf32, #tpu.memory_space<vmem>>, vector<9x128xf32>,
    return
  }
  func.func @transform_0(%arg0: i32) -> (i32, i32) {
    %c0_i32 = arith.constant 0 : i32
    %c0_i32_0 = arith.constant 0 : i32
    return %c0_i32, %arg0 : i32, i32
  }
  func.func @transform_1(%arg0: i32) -> (i32, i32) {
    %c0_i32 = arith.constant 0 : i32
    %c0_i32_0 = arith.constant 0 : i32
    %c0_i32_1 = arith.constant 0 : i32
    return %c0_i32, %c0_i32_0 : i32, i32
  }
  func.func @transform_2(%arg0: i32) -> (i32, i32) {
    %c0_i32 = arith.constant 0 : i32
    %c0_i32_0 = arith.constant 0 : i32
    %c0_i32_1 = arith.constant 0 : i32
    return %c0_i32, %c0_i32_0 : i32, i32
  }
  func.func @transform_3(%arg0: i32) -> (i32, i32) {
    %c0_i32 = arith.constant 0 : i32
    %c0_i32_0 = arith.constant 0 : i32
    %c0_i32_1 = arith.constant 0 : i32
    return %c0_i32, %c0_i32_0 : i32, i32
  }
  func.func @transform_4(%arg0: i32) -> (i32, i32) {
    %c0_i32 = arith.constant 0 : i32
    %c0_i32_0 = arith.constant 0 : i32
    return %c0_i32, %arg0 : i32, i32
  }
}

</mosaic_0001>

<bundles_post_ra>
// kernel: mlp_uniboinail_forward.1
= control target key start
LH: loop header
LB: loop body
LE: loop exit
PB: predicated region body
PF: predicated region fallthrough
CT: control target
= control target key end

     0   :  { %vm29_vm0 = vcmask 1043456   ;;  %vm25_vm1 = vcmask 31744   ;;  %v217_v0 = vmov 0.0   ;;  %vm218_vm2 = vmmov 0   ;;  %s266_s0 = inlined_call_operand.vmem [shape: f32[4,128], index: 0, kind: input, shape index: {}]   ;;  %s267_s1 = inlined_call_operand.vmem [shape: f32[8,4], index: 1, kind: input, shape index: {}]   ;;  %s268_s2 = inlined_call_operand.vmem [shape: f32[8,1], index: 2, kind: input, shape index: {}]   ;;  %s269_s3 = inlined_call_operand.vmem [shape: f32[9,8], index: 3, kind: input, shape index: {}]   ;;  %s270_s4 = inlined_call_operand.vmem [shape: f32[9,128], index: 4, kind: output, shape index: {}]  }
   0x1   :  { %203 = vmatprep.subr.mxu0 %v217_v0  ;;  %v18_v1 = vld [vmem:[%s266_s0] sm:$0xf]  ;;  %205 = vmatprep.mubr.msk.f32.mxu0 %vm218_vm2, %v217_v0  ;;  %v219_v4 = vmov 0   ;;  %vm106_vm3 = vcmask 64512   ;;  %v105_v11 = vld [vmem:[%s269_s3 + $0x8] sm:$0x1] }
   0x2   :  { %v17_v2 = vld [vmem:[%s267_s1] sm:$0xff]  ;;  %204 = vmatpush3.msk.msra.mxu0 %vm29_vm0, %v18_v1  ;;  %216 = vset.pattern.permute.xlu0 %v219_v4 }
   0x3   :  { %v19_v3 = vld [vmem:[%s268_s2] sm:$0xff]  ;;  %206 = vmatmul.mubr.msk.f32.vlgmr.msra.gmra.mrb[0].mxu0 %vm25_vm1, %v17_v2 }
   0x4   :  { %22 = vperm.xlu0 %216, %v19_v3   ;;  %v104_v5 = vld [vmem:[%s269_s3] sm:$0xff] }
   0x5   :  { %210 = vmatprep.mubr.msk.f32.mxu1 %vm106_vm3, %v104_v5 }
  0x83   :  { %v23_v6 = vpop.permute.xlu0 %22 }
  0xd6   :  { %v99_v7 = vpop.f32.mrb[0].mxu0 }
  0xd7   :  { %v100_v8 = vadd.f32 %v99_v7, %v23_v6  ;;  %v207_v9 = vpop.f32.mrb[1].mxu0 }
  0xd9   :  { %v103_v10 = vmax.f32 %v100_v8, 0.0 }
  0xdb   :  { %208 = vmatprep.subr.mxu1 %v103_v10 }
  0xdc   :  { %209 = vmatpush3.msra.mxu1 %v103_v10 }
  0xdd   :  { %211 = vmatmul.mubr.msk.f32.vlgmr.msra.gmra.mrb[0].mxu1 %vm106_vm3, %v105_v11 }
 0x1b0   :  { %v212_v12 = vpop.f32.mrb[0].mxu1 }
 0x1b1   :  { %189 = vst [vmem:[%s270_s4 + $0x8] sm:$0x1] %v212_v12  ;;  %v179_v13 = vpop.f32.mrb[1].mxu1 }
 0x1b2   :  { %188 = vst [vmem:[%s270_s4] sm:$0xff] %v179_v13 }

</bundles_post_ra>
